<compile_context>
chip_gen: v6e
topology: v6e:2x2x1
jax: 0.10.0
libtpu: 0.0.40
codegen_flags: <defaults>
</compile_context>

<pallas_src>
import jax
import jax.numpy as jnp
from jax import lax
from jax.experimental import pallas as pl
from jax.experimental.pallas import tpu as pltpu

KERNEL_SIZE = 7
PAD = KERNEL_SIZE // 2
LANE = 128          # lane-dense padding multiple (sufficient on v5e; fine on v6e/v7x)
MAX_MXU_ROWS = 256  # target matmul M rows per grid step (v6e/v7x MXU height)


def tam_kernel(x_ref, wmax_ref, wavg_ref, b_ref, o_ref):
    # x_ref    : (Nb, C, HWp)     activations, native dtype               (VMEM)
    # wmax_ref : (HWp, HWp) bf16  folded conv weights, max-pool channel   (VMEM, 1-buffered)
    # wavg_ref : (HWp, HWp) bf16  folded conv weights, avg-pool channel   (1/C folded in)
    # b_ref    : (1,)       f32   conv bias                               (SMEM)
    # o_ref    : (Nb, C, HWp)     output                                  (VMEM)
    x = x_ref[...]                                        # consumed only by the reductions
    x_max = jnp.max(x, axis=1)                            # (Nb, HWp) channel max
    x_sum = jnp.sum(x, axis=1, dtype=jnp.float32)         # (Nb, HWp) plain sum; 1/C in wavg

    # Two accumulating MXU matmuls (bf16 operands, f32 accumulation); no lane concat.
    conv = jnp.dot(x_max.astype(jnp.bfloat16), wmax_ref[...],
                   preferred_element_type=jnp.float32)
    conv = conv + jnp.dot(x_sum.astype(jnp.bfloat16), wavg_ref[...],
                          preferred_element_type=jnp.float32)

    attn = jax.nn.sigmoid(conv + b_ref[0])                # (Nb, HWp) f32 (EUP path)

    # Epilogue re-reads x_ref (breaks x's live range across the matmuls -> cheap vld
    # instead of vreg spills at large Nb); multiply in f32, cast only at the store.
    o_ref[...] = (x_ref[...].astype(jnp.float32) * attn[:, None, :]).astype(o_ref.dtype)


def _build_conv_matrices(weight, C, H, W, HW_pad):
    """Fold the KSxKS padded conv into two dense matmul matrices (pure weight reorg).

    wmat[(hi*W + wi), (ho*W + wo)] = weight[0, c, hi-ho+PAD, wi-wo+PAD]  (0 outside
    the kernel support).  The mean's 1/C scale is folded into the avg half.
    """
    hi = jnp.arange(H)
    wi = jnp.arange(W)
    dh = hi[:, None] - hi[None, :] + PAD                  # (H, H): hi x ho
    dw = wi[:, None] - wi[None, :] + PAD                  # (W, W): wi x wo
    vh = (dh >= 0) & (dh < KERNEL_SIZE)
    vw = (dw >= 0) & (dw < KERNEL_SIZE)
    dhc = jnp.clip(dh, 0, KERNEL_SIZE - 1)
    dwc = jnp.clip(dw, 0, KERNEL_SIZE - 1)
    w2 = weight[0][:, dhc[:, :, None, None], dwc[None, None, :, :]]   # (2, H, H, W, W)
    valid = vh[:, :, None, None] & vw[None, None, :, :]
    w2 = jnp.where(valid[None], w2, 0.0)
    w2 = w2.transpose(0, 1, 3, 2, 4).reshape(2, H * W, H * W)   # rows (hi,wi), cols (ho,wo)
    wmax = w2[0]
    wavg = w2[1] * (1.0 / C)                              # fold the mean's 1/C scale
    hw = H * W
    if HW_pad != hw:
        pad = ((0, HW_pad - hw), (0, HW_pad - hw))
        wmax = jnp.pad(wmax, pad)
        wavg = jnp.pad(wavg, pad)
    return wmax.astype(jnp.bfloat16), wavg.astype(jnp.bfloat16)


def _vmem_limit_bytes():
    """Generation-aware scoped-VMEM limit (v7x: 64 MiB/TC physical; v5e/v6e: 128 MiB)."""
    phys = 128 * 1024 * 1024
    try:
        phys = int(getattr(pltpu.get_tpu_info(), "vmem_capacity_bytes", phys))
    except Exception:
        pass
    return 32 * 1024 * 1024 if phys <= 64 * 1024 * 1024 else 64 * 1024 * 1024


def _pick_block_n(N, C, HW_pad, itemsize, vmem_limit, weight_bytes):
    """Batch rows per grid step: sized against VMEM counting every resident buffer
    (2x input block, 2x output block, single-buffered weights), capped at ~one MXU
    pass of rows, and <= N//2 so the grid has >= 2 steps (both v7x TCs get work)
    whenever N permits."""
    per_n = 4 * C * HW_pad * itemsize               # 2x(in block) + 2x(out block)
    avail = vmem_limit - weight_bytes - (2 << 20)   # headroom for scratch / misc
    nb = max(1, min(MAX_MXU_ROWS, avail // per_n)) if avail > 0 else 1
    if N >= 2:
        nb = min(nb, max(1, N // 2))
    return int(max(1, min(nb, N)))


@jax.jit
def tam_forward(x, weight, bias):
    N, C, H, W = x.shape
    HW = H * W
    HW_pad = -(-HW // LANE) * LANE                  # lane-dense spatial width
    wmax, wavg = _build_conv_matrices(weight, C, H, W, HW_pad)
    b = bias.reshape((1,)).astype(jnp.float32)

    x2 = x.reshape(N, C, HW)                        # free reshape: spatial -> lane axis
    if HW_pad != HW:
        x2 = jnp.pad(x2, ((0, 0), (0, 0), (0, HW_pad - HW)))

    vmem_limit = _vmem_limit_bytes()
    weight_bytes = 2 * HW_pad * HW_pad * 2          # two bf16 halves, single-buffered
    nb = _pick_block_n(N, C, HW_pad, x.dtype.itemsize, vmem_limit, weight_bytes)

    N_pad = -(-N // nb) * nb                        # pad batch so nb always divides
    if N_pad != N:
        x2 = jnp.pad(x2, ((0, N_pad - N), (0, 0), (0, 0)))
    grid = (N_pad // nb,)

    out = pl.pallas_call(
        tam_kernel,
        out_shape=jax.ShapeDtypeStruct((N_pad, C, HW_pad), x.dtype),
        grid_spec=pltpu.PrefetchScalarGridSpec(
            num_scalar_prefetch=0,
            grid=grid,
            in_specs=[
                pl.BlockSpec((nb, C, HW_pad), lambda n: (n, 0, 0)),
                # Grid-invariant folded conv weights -> single-buffered: their
                # index_map is constant, so a second pipeline buffer is pure VMEM waste.
                pl.BlockSpec((HW_pad, HW_pad), lambda n: (0, 0),
                             pipeline_mode=pl.Buffered(1)),
                pl.BlockSpec((HW_pad, HW_pad), lambda n: (0, 0),
                             pipeline_mode=pl.Buffered(1)),
                pl.BlockSpec(memory_space=pltpu.MemorySpace.SMEM),
            ],
            out_specs=pl.BlockSpec((nb, C, HW_pad), lambda n: (n, 0, 0)),
        ),
        compiler_params=pltpu.CompilerParams(
            # Batch rows are independent -> shard the grid across v7x's two TCs.
            dimension_semantics=("parallel",),
            vmem_limit_bytes=vmem_limit,
        ),
    )(x2, wmax, wavg, b)

    out = out[:N, :, :HW]
    return out.reshape(N, C, H, W)


def tam_reference(x, weight, bias):
    # Pure-JAX reference mirroring the PyTorch forward (fp32 throughout).
    x_max = jnp.max(x, axis=1, keepdims=True)
    x_avg = jnp.mean(x, axis=1, keepdims=True)
    feat = jnp.concatenate([x_max, x_avg], axis=1)
    conv = lax.conv_general_dilated(
        feat, weight, window_strides=(1, 1),
        padding=[(PAD, PAD), (PAD, PAD)],
        dimension_numbers=("NCHW", "OIHW", "NCHW"))
    conv = conv + bias.reshape(1, 1, 1, 1)
    return x * jax.nn.sigmoid(conv)


if __name__ == "__main__":
    key = jax.random.PRNGKey(0)
    kx, kw, kb = jax.random.split(key, 3)

    N, C, H, W = 2, 4, 16, 16
    x = jax.random.normal(kx, (N, C, H, W), dtype=jnp.float32)

    # Deterministic synthetic Conv2d(2 -> 1, k=7) parameters (not a checkpoint).
    fan_in = 2 * KERNEL_SIZE * KERNEL_SIZE
    bound = 1.0 / (fan_in ** 0.5)
    weight = jax.random.uniform(kw, (1, 2, KERNEL_SIZE, KERNEL_SIZE),
                                minval=-bound, maxval=bound, dtype=jnp.float32)
    bias = jax.random.uniform(kb, (1,), minval=-bound, maxval=bound,
                              dtype=jnp.float32)

    out = jax.block_until_ready(tam_forward(x, weight, bias))

    ref = tam_reference(x, weight, bias)
    assert out.shape == ref.shape and out.dtype == ref.dtype
    max_err = float(jnp.max(jnp.abs(out - ref)))
    # bf16 MXU operands with K = H*W accumulation -> looser tolerance than an fp32 conv;
    # typical max abs error at this shape is ~1e-3 (error grows with K at larger H*W).
    if max_err > 5e-2:
        raise AssertionError(f"Pallas TAM mismatch vs reference: {max_err}")

    print("KERNEL_OK")
</pallas_src>

<mosaic_0001>
module attributes {stable_mosaic.version = 11 : i64} {
  func.func @tam_kernel(%arg0: i32, %arg1: memref<1x4x256xf32, #tpu.memory_space<vmem>>, %arg2: memref<256x256xbf16, #tpu.memory_space<vmem>>, %arg3: memref<256x256xbf16, #tpu.memory_space<vmem>>, %arg4: memref<1xf32, #tpu.memory_space<smem>>, %arg5: memref<1x4x256xf32, #tpu.memory_space<vmem>>) attributes {dimension_semantics = [#tpu.dimension_semantics<parallel>], iteration_bounds = array<i64: 2>, scalar_prefetch = 0 : i64, scratch_operands = 0 : i64, tpu.core_type = #tpu.core_type<tc>, window_params = [{transform_indices = @transform_0, window_bounds = array<i64: 1, 4, 256>}, {pipeline_mode = #tpu.pipeline_mode<synchronous>, transform_indices = @transform_1, window_bounds = array<i64: 256, 256>}, {pipeline_mode = #tpu.pipeline_mode<synchronous>, transform_indices = @transform_2, window_bounds = array<i64: 256, 256>}, {transform_indices = @transform_3, window_bounds = array<i64: 1>}, {transform_indices = @transform_4, window_bounds = array<i64: 1, 4, 256>}]} {
    %c0 = arith.constant 0 : index
    %c0_0 = arith.constant 0 : index
    %c0_1 = arith.constant 0 : index
    %0 = vector.load %arg1[%c0, %c0_0, %c0_1] : memref<1x4x256xf32, #tpu.memory_space<vmem>>, vector<1x4x256xf32>
    %cst = arith.constant dense<0xFF800000> : vector<1x256xf32>
    %1 = vector.multi_reduction <maximumf>, %0, %cst [1] : vector<1x4x256xf32> to vector<1x256xf32>
    %cst_2 = arith.constant dense<0.000000e+00> : vector<1x256xf32>
    %2 = vector.multi_reduction <add>, %0, %cst_2 [1] : vector<1x4x256xf32> to vector<1x256xf32>
    %3 = arith.truncf %1 : vector<1x256xf32> to vector<1x256xbf16>
    %c0_3 = arith.constant 0 : index
    %c0_4 = arith.constant 0 : index
    %4 = vector.load %arg2[%c0_3, %c0_4] : memref<256x256xbf16, #tpu.memory_space<vmem>>, vector<256x256xbf16>
    %cst_5 = arith.constant dense<0.000000e+00> : vector<1x256xf32>
    %5 = tpu.matmul %3, %4, %cst_5 {dimension_numbers = #tpu.dot_dimension_numbers<[1], [0], [0], [1], [0, 0, 1, 1], [], []>} : vector<1x256xbf16>, vector<256x256xbf16>, vector<1x256xf32> -> vector<1x256xf32>
    %6 = arith.truncf %2 : vector<1x256xf32> to vector<1x256xbf16>
    %c0_6 = arith.constant 0 : index
    %c0_7 = arith.constant 0 : index
    %7 = vector.load %arg3[%c0_6, %c0_7] : memref<256x256xbf16, #tpu.memory_space<vmem>>, vector<256x256xbf16>
    %cst_8 = arith.constant dense<0.000000e+00> : vector<1x256xf32>
    %8 = tpu.matmul %6, %7, %cst_8 {dimension_numbers = #tpu.dot_dimension_numbers<[1], [0], [0], [1], [0, 0, 1, 1], [], []>} : vector<1x256xbf16>, vector<256x256xbf16>, vector<1x256xf32> -> vector<1x256xf32>
    %9 = arith.addf %5, %8 : vector<1x256xf32>
    %c0_9 = arith.constant 0 : index
    %10 = memref.load %arg4[%c0_9] : memref<1xf32, #tpu.memory_space<smem>>
    %11 = vector.broadcast %10 : f32 to vector<1x256xf32>
    %12 = arith.addf %9, %11 : vector<1x256xf32>
    %13 = arith.negf %12 : vector<1x256xf32>
    %14 = math.exp %13 : vector<1x256xf32>
    %cst_10 = arith.constant 1.000000e+00 : f32
    %15 = vector.broadcast %cst_10 : f32 to vector<1x256xf32>
    %16 = arith.addf %15, %14 : vector<1x256xf32>
    %17 = arith.divf %15, %16 : vector<1x256xf32>
    %c0_11 = arith.constant 0 : index
    %c0_12 = arith.constant 0 : index
    %c0_13 = arith.constant 0 : index
    %18 = vector.load %arg1[%c0_11, %c0_12, %c0_13] : memref<1x4x256xf32, #tpu.memory_space<vmem>>, vector<1x4x256xf32>
    %19 = vector.shape_cast %17 : vector<1x256xf32> to vector<1x1x256xf32>
    %20 = vector.broadcast %19 : vector<1x1x256xf32> to vector<1x4x256xf32>
    %21 = arith.mulf %18, %20 : vector<1x4x256xf32>
    %c0_14 = arith.constant 0 : index
    %c0_15 = arith.constant 0 : index
    %c0_16 = arith.constant 0 : index
    %22 = vector.load %arg5[%c0_14, %c0_15, %c0_16] : memref<1x4x256xf32, #tpu.memory_space<vmem>>, vector<1x4x256xf32>
    tpu.vector_store %arg5[%c0_14, %c0_15, %c0_16], %21 {strides = array<i32>} : memref<1x4x256xf32, #tpu.memory_space<vmem>>, vector<1x4x256xf32>,
    return
  }
  func.func @transform_0(%arg0: i32) -> (i32, i32, i32) {
    %c0_i32 = arith.constant 0 : i32
    %c0_i32_0 = arith.constant 0 : i32
    %c0_i32_1 = arith.constant 0 : i32
    return %arg0, %c0_i32, %c0_i32_0 : i32, i32, i32
  }
  func.func @transform_1(%arg0: i32) -> (i32, i32) {
    %c0_i32 = arith.constant 0 : i32
    %c0_i32_0 = arith.constant 0 : i32
    %c0_i32_1 = arith.constant 0 : i32
    return %c0_i32, %c0_i32_0 : i32, i32
  }
  func.func @transform_2(%arg0: i32) -> (i32, i32) {
    %c0_i32 = arith.constant 0 : i32
    %c0_i32_0 = arith.constant 0 : i32
    %c0_i32_1 = arith.constant 0 : i32
    return %c0_i32, %c0_i32_0 : i32, i32
  }
  func.func @transform_3(%arg0: i32) -> i32 {
    %c0_i32 = arith.constant 0 : i32
    %c0_i32_0 = arith.constant 0 : i32
    return %c0_i32 : i32
  }
  func.func @transform_4(%arg0: i32) -> (i32, i32, i32) {
    %c0_i32 = arith.constant 0 : i32
    %c0_i32_0 = arith.constant 0 : i32
    %c0_i32_1 = arith.constant 0 : i32
    return %arg0, %c0_i32, %c0_i32_0 : i32, i32, i32
  }
}

</mosaic_0001>

<bundles_post_ra>
// kernel: tam_forward.1
= control target key start
LH: loop header
LB: loop body
LE: loop exit
PB: predicated region body
PF: predicated region fallthrough
CT: control target
= control target key end

     0   :  { %s1015_s17 = smov 0   ;;  %s1246_s0 = inlined_call_operand.vmem [shape: f32[2,4,256], index: 0, kind: input, shape index: {}]   ;;  %s1247_s1 = inlined_call_operand.vmem [shape: bf16[256,256], index: 1, kind: input, shape index: {}]   ;;  %s1248_s2 = inlined_call_operand.vmem [shape: bf16[256,256], index: 2, kind: input, shape index: {}]   ;;  %s1249_s3 = inlined_call_operand.<no memory space> [shape: f32[1], index: 3, kind: input, shape index: {}]   ;;  %s1250_s4 = inlined_call_operand.vmem [shape: f32[2,4,256], index: 4, kind: output, shape index: {}]  }
   0x1   :  { %9 = sst [smem:[#allocation2]] %s1249_s3 }
   0x2 LB: > { %s787_s18 = sadd.s32 4294967295, %s985_s17   ;;  %p791_p0 = scmp.ge.s32.totalorder %s985_s17, 1  ;;  %s985_s17 = sphi %s1015_s17, %s15_s17  }
   0x3   : > { %p163_p1 = scmp.lt.s32.totalorder %s985_s17, 3 }
   0x5   : > { %p164_p2 = pnand %p791_p0, %p163_p1 }
   0x6   : > { %p189_p3 = scmp.lt.s32.totalorder (!%p164_p2), %s787_s18, 1  ;;  %s702_s27 = sld [smem:[#allocation2]] (!%p164_p2) }
   0x7   : > { %167 = sbr.rel (%p164_p2) target bundleno = 316 (0x13c), region = 36 }
   0xc   : > { %v874_v0 = vld [vmem:[%s1248_s2 + $0x74] ss:$8 sps:$4 sm:$0xff]   ;;  %v878_v2 = vld [vmem:[%s1248_s2 + $0x70] ss:$8 sps:$4 sm:$0xff]   ;;  %v880_v4 = vld [vmem:[%s1248_s2 + $0x64] ss:$8 sps:$4 sm:$0xff]  }
   0xd   : > { %v876_v1 = vld [vmem:[%s1247_s1 + $0x74] ss:$8 sps:$4 sm:$0xff]   ;;  %460 = vmatprep.subr.bf16.mxu0 %v874_v0  ;;  %v879_v3 = vld [vmem:[%s1247_s1 + $0x70] ss:$8 sps:$4 sm:$0xff]   ;;  %v882_v5 = vld [vmem:[%s1247_s1 + $0x64] ss:$8 sps:$4 sm:$0xff]  }
   0xe   : > { %661 = vmatprep.subr.bf16.mxu1 %v876_v1  ;;  %461 = vmatpush1.bf16.msra.mxu0 %v878_v2  ;;  %v884_v6 = vld [vmem:[%s1248_s2 + $0x60] ss:$8 sps:$4 sm:$0xff]   ;;  %v886_v8 = vld [vmem:[%s1248_s2 + $0x54] ss:$8 sps:$4 sm:$0xff]   ;;  %v890_v10 = vld [vmem:[%s1248_s2 + $0x50] ss:$8 sps:$4 sm:$0xff]  }
   0xf   : > { %662 = vmatpush1.bf16.msra.mxu1 %v879_v3  ;;  %462 = vmatprep.subr.bf16.mxu0 %v880_v4  ;;  %v885_v7 = vld [vmem:[%s1247_s1 + $0x60] ss:$8 sps:$4 sm:$0xff]   ;;  %v888_v9 = vld [vmem:[%s1247_s1 + $0x54] ss:$8 sps:$4 sm:$0xff]   ;;  %v891_v11 = vld [vmem:[%s1247_s1 + $0x50] ss:$8 sps:$4 sm:$0xff]  }
  0x10   : > { %663 = vmatprep.subr.bf16.mxu1 %v882_v5  ;;  %v892_v12 = vld [vmem:[%s1248_s2 + $0x44] ss:$8 sps:$4 sm:$0xff]   ;;  %v896_v14 = vld [vmem:[%s1248_s2 + $0x40] ss:$8 sps:$4 sm:$0xff]   ;;  %v898_v16 = vld [vmem:[%s1248_s2 + $0x34] ss:$8 sps:$4 sm:$0xff]  }
  0x11   : > { %v894_v13 = vld [vmem:[%s1247_s1 + $0x44] ss:$8 sps:$4 sm:$0xff]   ;;  %v897_v15 = vld [vmem:[%s1247_s1 + $0x40] ss:$8 sps:$4 sm:$0xff]   ;;  %v900_v17 = vld [vmem:[%s1247_s1 + $0x34] ss:$8 sps:$4 sm:$0xff]  }
  0x12   : > { %463 = vmatpush1.bf16.msra.mxu0 %v884_v6  ;;  %v902_v18 = vld [vmem:[%s1248_s2 + $0x30] ss:$8 sps:$4 sm:$0xff]   ;;  %v904_v20 = vld [vmem:[%s1248_s2 + $0x24] ss:$8 sps:$4 sm:$0xff]   ;;  %v908_v22 = vld [vmem:[%s1248_s2 + $0x20] ss:$8 sps:$4 sm:$0xff]  }
  0x13   : > { %664 = vmatpush1.bf16.msra.mxu1 %v885_v7  ;;  %464 = vmatprep.subr.bf16.mxu0 %v886_v8  ;;  %v903_v19 = vld [vmem:[%s1247_s1 + $0x30] ss:$8 sps:$4 sm:$0xff]   ;;  %v906_v21 = vld [vmem:[%s1247_s1 + $0x24] ss:$8 sps:$4 sm:$0xff]   ;;  %v909_v23 = vld [vmem:[%s1247_s1 + $0x20] ss:$8 sps:$4 sm:$0xff]  }
  0x14   : > { %665 = vmatprep.subr.bf16.mxu1 %v888_v9  ;;  %v910_v24 = vld [vmem:[%s1248_s2 + $0x14] ss:$8 sps:$4 sm:$0xff]   ;;  %v914_v26 = vld [vmem:[%s1248_s2 + $0x10] ss:$8 sps:$4 sm:$0xff]   ;;  %v916_v28 = vld [vmem:[%s1248_s2 + $0x4] ss:$8 sps:$4 sm:$0xff]  }
  0x15   : > { %v912_v25 = vld [vmem:[%s1247_s1 + $0x14] ss:$8 sps:$4 sm:$0xff]   ;;  %v915_v27 = vld [vmem:[%s1247_s1 + $0x10] ss:$8 sps:$4 sm:$0xff]   ;;  %v918_v29 = vld [vmem:[%s1247_s1 + $0x4] ss:$8 sps:$4 sm:$0xff]  }
  0x16   : > { %465 = vmatpush1.bf16.msra.mxu0 %v890_v10  ;;  %v920_v30 = vld [vmem:[%s1248_s2] ss:$8 sps:$4 sm:$0xff]   ;;  %v922_v32 = vld [vmem:[%s1248_s2 + $0xf4] ss:$8 sps:$4 sm:$0xff]   ;;  %v926_v34 = vld [vmem:[%s1248_s2 + $0xf0] ss:$8 sps:$4 sm:$0xff]  }
  0x17   : > { %666 = vmatpush1.bf16.msra.mxu1 %v891_v11  ;;  %466 = vmatprep.subr.bf16.mxu0 %v892_v12  ;;  %v921_v31 = vld [vmem:[%s1247_s1] ss:$8 sps:$4 sm:$0xff]   ;;  %v924_v33 = vld [vmem:[%s1247_s1 + $0xf4] ss:$8 sps:$4 sm:$0xff]   ;;  %v927_v35 = vld [vmem:[%s1247_s1 + $0xf0] ss:$8 sps:$4 sm:$0xff]  }
  0x18   : > { %667 = vmatprep.subr.bf16.mxu1 %v894_v13  ;;  %v928_v36 = vld [vmem:[%s1248_s2 + $0xe4] ss:$8 sps:$4 sm:$0xff]   ;;  %s1252_s18 = smov (!%p189_p3, %s787_s18), 1  ;;  %v932_v38 = vld [vmem:[%s1248_s2 + $0xe0] ss:$8 sps:$4 sm:$0xff]   ;;  %vm203_vm0 = vcmask 1043456  }
  0x19   : > { %v930_v37 = vld [vmem:[%s1247_s1 + $0xe4] ss:$8 sps:$4 sm:$0xff]   ;;  %v933_v39 = vld [vmem:[%s1247_s1 + $0xe0] ss:$8 sps:$4 sm:$0xff]   ;;  %v934_v40 = vld [vmem:[%s1248_s2 + $0xd4] ss:$8 sps:$4 sm:$0xff]  }
  0x1a   : > { %467 = vmatpush1.bf16.msra.mxu0 %v896_v14  ;;  %s864_s25 = sshll.u32 %s1252_s18, 3  ;;  %v936_v41 = vld [vmem:[%s1247_s1 + $0xd4] ss:$8 sps:$4 sm:$0xff]   ;;  %v938_v42 = vld [vmem:[%s1248_s2 + $0xd0] ss:$8 sps:$4 sm:$0xff]  }
  0x1b   : > { %668 = vmatpush1.bf16.msra.mxu1 %v897_v15  ;;  %468 = vmatprep.subr.bf16.mxu0 %v898_v16  ;;  %v939_v43 = vld [vmem:[%s1247_s1 + $0xd0] ss:$8 sps:$4 sm:$0xff]   ;;  %s193_s8 = scalar_lea.vmem %s1246_s0, %s864_s25  ;;  %v940_v44 = vld [vmem:[%s1248_s2 + $0xc4] ss:$8 sps:$4 sm:$0xff]   ;;  %v944_v50 = vld [vmem:[%s1248_s2 + $0xc0] ss:$8 sps:$4 sm:$0xff]   ;;  %s198_s30 = scalar_lea.vmem %s1250_s4, %s864_s25 }
  0x1c   : > { %669 = vmatprep.subr.bf16.mxu1 %v900_v17  ;;  %v942_v45 = vld [vmem:[%s1247_s1 + $0xc4] ss:$8 sps:$4 sm:$0xff]   ;;  %v945_v51 = vld [vmem:[%s1247_s1 + $0xc0] ss:$8 sps:$4 sm:$0xff]   ;;  %v946_v54 = vld [vmem:[%s1248_s2 + $0xb4] ss:$8 sps:$4 sm:$0xff]  }
  0x1d   : > { %v1173_v46 = vld [vmem:[%s193_s8] sm:$0xff]  ;;  %v948_v55 = vld [vmem:[%s1247_s1 + $0xb4] ss:$8 sps:$4 sm:$0xff]   ;;  %v950_v62 = vld [vmem:[%s1248_s2 + $0xb0] ss:$8 sps:$4 sm:$0xff]  }
  0x1e   : > { %469 = vmatpush1.bf16.msra.mxu0 %v902_v18  ;;  %v201_v47 = vcombine.high %v1173_v46, %v1173_v46  ;;  %v218_v48 = vsel %vm203_vm0, %v1173_v46, 0.0  ;;  %v204_v49 = vsel %vm203_vm0, %v1173_v46, -inf  ;;  %v951_v63 = vld [vmem:[%s1247_s1 + $0xb0] ss:$8 sps:$4 sm:$0xff]   ;;  %v952_v4 = vld [vmem:[%s1248_s2 + $0xa4] ss:$8 sps:$4 sm:$0xff]  }
  0x1f   : > { %670 = vmatpush1.bf16.msra.mxu1 %v903_v19  ;;  %470 = vmatprep.subr.bf16.mxu0 %v904_v20  ;;  %v219_v52 = vrot.slane %v218_v48, 4  ;;  %v205_v53 = vrot.slane %v204_v49, 4  ;;  %v954_v5 = vld [vmem:[%s1247_s1 + $0xa4] ss:$8 sps:$4 sm:$0xff]   ;;  %v956_v10 = vld [vmem:[%s1248_s2 + $0xa0] ss:$8 sps:$4 sm:$0xff]  }
  0x20   : > { %671 = vmatprep.subr.bf16.mxu1 %v906_v21  ;;  %v225_v56 = vsel %vm203_vm0, %v201_v47, 0.0  ;;  %v211_v57 = vsel %vm203_vm0, %v201_v47, -inf  ;;  %v957_v11 = vld [vmem:[%s1247_s1 + $0xa0] ss:$8 sps:$4 sm:$0xff]   ;;  %v958_v14 = vld [vmem:[%s1248_s2 + $0x94] ss:$8 sps:$4 sm:$0xff]  }
  0x21   : > { %v226_v58 = vrot.slane %v225_v56, 4  ;;  %v212_v59 = vrot.slane %v211_v57, 4  ;;  %v220_v60 = vadd.f32 %v219_v52, %v218_v48  ;;  %v206_v61 = vmax.f32 %v204_v49, %v205_v53  ;;  %v960_v15 = vld [vmem:[%s1247_s1 + $0x94] ss:$8 sps:$4 sm:$0xff]   ;;  %v962_v20 = vld [vmem:[%s1248_s2 + $0x90] ss:$8 sps:$4 sm:$0xff]  }
  0x22   : > { %471 = vmatpush1.bf16.msra.mxu0 %v908_v22  ;;  %v963_v21 = vld [vmem:[%s1247_s1 + $0x90] ss:$8 sps:$4 sm:$0xff]  }
  0x23   : > { %672 = vmatpush1.bf16.msra.mxu1 %v909_v23  ;;  %472 = vmatprep.subr.bf16.mxu0 %v910_v24  ;;  %v227_v0 = vadd.f32 %v226_v58, %v225_v56  ;;  %v213_v1 = vmax.f32 %v211_v57, %v212_v59  ;;  %v221_v2 = vrot.slane %v220_v60, 2  ;;  %v207_v3 = vrot.slane %v206_v61, 2  ;;  %v964_v24 = vld [vmem:[%s1248_s2 + $0x84] ss:$8 sps:$4 sm:$0xff]  }
  0x24   : > { %673 = vmatprep.subr.bf16.mxu1 %v912_v25  ;;  %v966_v25 = vld [vmem:[%s1247_s1 + $0x84] ss:$8 sps:$4 sm:$0xff]  }
  0x25   : > { %v228_v6 = vrot.slane %v227_v0, 2  ;;  %v214_v7 = vrot.slane %v213_v1, 2  ;;  %v222_v8 = vadd.f32 %v221_v2, %v220_v60  ;;  %v208_v9 = vmax.f32 %v206_v61, %v207_v3 }
  0x26   : > { %473 = vmatpush1.bf16.msra.mxu0 %v914_v26 }
  0x27   : > { %674 = vmatpush1.bf16.msra.mxu1 %v915_v27  ;;  %474 = vmatprep.subr.bf16.mxu0 %v916_v28  ;;  %v229_v12 = vadd.f32 %v228_v6, %v227_v0  ;;  %v215_v13 = vmax.f32 %v213_v1, %v214_v7  ;;  %v223_v18 = vrot.slane %v222_v8, 1  ;;  %v209_v19 = vrot.slane %v208_v9, 1 }
  0x28   : > { %675 = vmatprep.subr.bf16.mxu1 %v918_v29 }
  0x29   : > { %v230_v16 = vrot.slane %v229_v12, 1  ;;  %v216_v17 = vrot.slane %v215_v13, 1  ;;  %v224_v28 = vadd.f32 %v223_v18, %v222_v8  ;;  %v210_v29 = vmax.f32 %v208_v9, %v209_v19 }
  0x2a   : > { %475 = vmatpush1.bf16.msra.mxu0 %v920_v30  ;;  %v968_v30 = vld [vmem:[%s1248_s2 + $0x80] ss:$8 sps:$4 sm:$0xff]  }
  0x2b   : > { %676 = vmatpush1.bf16.msra.mxu1 %v921_v31  ;;  %476 = vmatprep.subr.bf16.mxu0 %v922_v32  ;;  %v231_v22 = vadd.f32 %v230_v16, %v229_v12  ;;  %v217_v23 = vmax.f32 %v215_v13, %v216_v17  ;;  %v969_v31 = vld [vmem:[%s1247_s1 + $0x80] ss:$8 sps:$4 sm:$0xff]   ;;  %v266_v32 = vpack.c.bf16 %v224_v28, %v224_v28 }
  0x2c   : > { %677 = vmatprep.subr.bf16.mxu1 %v924_v33  ;;  %v232_v33 = vpack.c.bf16 %v210_v29, %v210_v29 }
  0x2d   : > { %v267_v26 = vpack.c.bf16 %v231_v22, %v231_v22  ;;  %v233_v27 = vpack.c.bf16 %v217_v23, %v217_v23 }
  0x2e   : > { %477 = vmatpush2.bf16.msra.mxu0 %v926_v34 }
  0x2f   : > { %678 = vmatpush2.bf16.msra.mxu1 %v927_v35  ;;  %478 = vmatprep.subr.bf16.mxu0 %v928_v36  ;;  %v703_v36 = vstv %s702_s27 }
  0x30   : > { %679 = vmatprep.subr.bf16.mxu1 %v930_v37  ;;  %492 = vmatprep.mubr.bf16.mxu0 %v267_v26 }
  0x31   : > { %693 = vmatprep.mubr.bf16.mxu1 %v233_v27 }
  0x32   : > { %479 = vmatpush2.bf16.msra.mxu0 %v932_v38 }
  0x33   : > { %680 = vmatpush2.bf16.msra.mxu1 %v933_v39  ;;  %480 = vmatprep.subr.bf16.mxu0 %v934_v40 }
  0x34   : > { %681 = vmatprep.subr.bf16.mxu1 %v936_v41 }
  0x36   : > { %481 = vmatpush2.bf16.msra.mxu0 %v938_v42 }
  0x37   : > { %682 = vmatpush2.bf16.msra.mxu1 %v939_v43  ;;  %482 = vmatprep.subr.bf16.mxu0 %v940_v44 }
  0x38   : > { %683 = vmatprep.subr.bf16.mxu1 %v942_v45 }
  0x3a   : > { %483 = vmatpush2.bf16.msra.mxu0 %v944_v50 }
  0x3b   : > { %684 = vmatpush2.bf16.msra.mxu1 %v945_v51  ;;  %484 = vmatprep.subr.bf16.mxu0 %v946_v54  ;;  %v718_v54 = vlaneseq }
  0x3c   : > { %685 = vmatprep.subr.bf16.mxu1 %v948_v55 }
  0x3d   : > { %v719_v55 = vshrl.u32 %v718_v54, 7 }
  0x3e   : > { %485 = vmatpush2.bf16.msra.mxu0 %v950_v62 }
  0x3f   : > { %686 = vmatpush2.bf16.msra.mxu1 %v951_v63  ;;  %486 = vmatprep.subr.bf16.mxu0 %v952_v4  ;;  %v720_v56 = vsub.s32 0, %v719_v55 }
  0x40   : > { %687 = vmatprep.subr.bf16.mxu1 %v954_v5 }
  0x42   : > { %487 = vmatpush2.bf16.msra.mxu0 %v956_v10 }
  0x43   : > { %688 = vmatpush2.bf16.msra.mxu1 %v957_v11  ;;  %488 = vmatprep.subr.bf16.mxu0 %v958_v14 }
  0x44   : > { %689 = vmatprep.subr.bf16.mxu1 %v960_v15 }
  0x46   : > { %489 = vmatpush2.bf16.msra.mxu0 %v962_v20 }
  0x47   : > { %690 = vmatpush2.bf16.msra.mxu1 %v963_v21  ;;  %490 = vmatprep.subr.bf16.mxu0 %v964_v24 }
  0x48   : > { %691 = vmatprep.subr.bf16.mxu1 %v966_v25 }
  0x4a   : > { %491 = vmatpush2.bf16.msra.mxu0 %v968_v30 }
  0x4b   : > { %692 = vmatpush2.bf16.msra.mxu1 %v969_v31 }
  0x4d   : > { %493 = vmatmul.mubr.bf16.vlgmr.msra.gmra.mxu0 %v266_v32 }
  0x4e   : > { %694 = vmatmul.mubr.bf16.vlgmr.msra.gmra.mxu1 %v232_v33 }
 0x10d   : > { %v494_v34 = vpop.f32.mrf.mxu0 }
 0x10e   : > { %v695_v35 = vpop.f32.mrf.mxu1 }
 0x10f   : > { %v696_v37 = vadd.f32 %v695_v35, %v494_v34  ;;  %v496_v38 = vpop.f32.mrf.mxu0 }
 0x110   : > { %v697_v39 = vpop.f32.mrf.mxu1 }
 0x111   : > { %v704_v40 = vadd.f32 %v703_v36, %v696_v37  ;;  %v698_v41 = vadd.f32 %v697_v39, %v496_v38  ;;  %v498_v42 = vpop.f32.mrf.mxu0 }
 0x112   : > { %v699_v43 = vpop.f32.mrf.mxu1 }
 0x113   : > { %v860_v44 = vmul.f32 -1.442695, %v704_v40  ;;  %v705_v45 = vadd.f32 %v703_v36, %v698_v41  ;;  %v499_v47 = vpop.f32.mrf.mxu0 }
 0x114   : > { %v700_v48 = vpop.f32.mrf.mxu1 }
 0x115   : > { %971 = vpow2.f32 %v860_v44  ;;  %v861_v49 = vmul.f32 -1.442695, %v705_v45 }
 0x117   : > { %973 = vpow2.f32 %v861_v49 }
 0x122   : > { %v972_v50 = vpop.eup %971 }
 0x123   : > { %v712_v51 = vadd.f32 1.0, %v972_v50 }
 0x124   : > { %v974_v52 = vpop.eup %973 }
 0x125   : > { %975 = vrcp.f32 %v712_v51  ;;  %v713_v53 = vadd.f32 1.0, %v974_v52 }
 0x127   : > { %977 = vrcp.f32 %v713_v53 }
 0x132   : > { %v976_v57 = vpop.eup %975 }
 0x133   : > { %v721_v59 = vrot.slane %v976_v57, %v720_v56 }
 0x134   : > { %v978_v58 = vpop.eup %977 }
 0x135   : > { %v725_v60 = vrot.slane %v978_v58, %v720_v56 }
 0x137   : > { %v728_v61 = vcombine.low %v721_v59, %v725_v60 }
 0x139   : > { %v730_v62 = vmul.f32 %v728_v61, %v1173_v46 }
 0x13b   : > { %731 = vst [vmem:[%s198_s30] sm:$0xff] %v730_v62 }
 0x13c PF: > { %s15_s17 = sadd.s32 1, %s985_s17  }
 0x13d   : > { %p12_p4 = scmp.ge.s32.totalorder %s15_s17, 4  }
 0x13f   :  { %14 = sbr.rel (!%p12_p4) target bundleno = 2 (0x2), region = 66 }

</bundles_post_ra>
